<compile_context>
chip_gen: v6e
topology: v6e:2x2x1
jax: 0.10.0
libtpu: 0.0.40
codegen_flags: <defaults>
</compile_context>

<pallas_src>
import math
from functools import partial

import jax
import jax.numpy as jnp
from jax.experimental import pallas as pl
from jax.experimental.pallas import tpu as pltpu

_EPS = 1e-5
_LOG_2PI = math.log(2.0 * math.pi)


def _round_up(x, m):
    return ((x + m - 1) // m) * m


# ----------------------------------------------------------------------------
# Fused kernel body (all actors + critic for one batch tile)
# ----------------------------------------------------------------------------
def make_fused_kernel(n_hidden, num_agents, action_dim, matmul_dtype):
    N, A = num_agents, action_dim

    def kernel(*refs):
        x_ref, noise_ref, bn_ref, sum_ref = refs[0:4]
        idx = 4
        actor_hidden = refs[idx: idx + 2 * n_hidden]; idx += 2 * n_hidden
        wmu_ref, bmu_ref, wlv_ref, blv_ref = refs[idx: idx + 4]; idx += 4
        critic_hidden = refs[idx: idx + 2 * n_hidden]; idx += 2 * n_hidden
        wv_ref, bv_ref = refs[idx], refs[idx + 1]; idx += 2
        action_ref, entropy_ref, logp_ref, v_ref = refs[idx: idx + 4]

        x = x_ref[...]                                   # [tb, N*S] f32
        bn = bn_ref[...]                                 # [4, N*S] folded BN affine
        xa = x * bn[0:1, :] + bn[1:2, :]                 # actor normalized input
        xc = x * bn[2:3, :] + bn[3:4, :]                 # critic normalized input

        # --- all agents' actor hidden layers: one block-diagonal matmul/layer
        for li in range(n_hidden):
            w = actor_hidden[2 * li][...]
            b = actor_hidden[2 * li + 1][...]
            xa = jnp.maximum(
                jnp.dot(xa.astype(matmul_dtype), w,
                        preferred_element_type=jnp.float32) + b, 0.0)

        xa_mm = xa.astype(matmul_dtype)
        mu = jnp.tanh(jnp.dot(xa_mm, wmu_ref[...],
                              preferred_element_type=jnp.float32) + bmu_ref[...])
        log_var = -jnp.maximum(
            jnp.dot(xa_mm, wlv_ref[...],
                    preferred_element_type=jnp.float32) + blv_ref[...], 0.0)
        sigma = jnp.exp(0.5 * log_var)                   # sqrt(exp(log_var))

        noise = noise_ref[...]                           # [tb, N*A] ~ N(0,1)
        action_ref[...] = mu + sigma * noise
        entropy_ref[...] = 0.5 + 0.5 * _LOG_2PI + 0.5 * log_var

        # log_prob per element = -0.5*noise^2 - 0.5*log_var - 0.5*log(2*pi)
        # (exact rewrite of Normal(mu, sigma).log_prob(mu + sigma*noise));
        # per-agent sum over A dims via precomputed block-indicator matmul.
        logp_elem = -0.5 * (noise * noise) - 0.5 * log_var
        logp_ref[...] = (jnp.dot(logp_elem, sum_ref[...],
                                 preferred_element_type=jnp.float32)
                         - 0.5 * A * _LOG_2PI)           # [tb, N]

        # --- critic on the (critic-)normalized flattened state
        for li in range(n_hidden):
            w = critic_hidden[2 * li][...]
            b = critic_hidden[2 * li + 1][...]
            xc = jnp.maximum(
                jnp.dot(xc.astype(matmul_dtype), w,
                        preferred_element_type=jnp.float32) + b, 0.0)
        v_ref[...] = (jnp.dot(xc.astype(matmul_dtype), wv_ref[...],
                              preferred_element_type=jnp.float32) + bv_ref[...])

    return kernel


# ----------------------------------------------------------------------------
# Parameter initialization (mirrors module __init__: xavier weights, BN 1/0)
# ----------------------------------------------------------------------------
def _xavier_uniform(key, fan_in, fan_out):
    bound = math.sqrt(6.0 / (fan_in + fan_out))
    return jax.random.uniform(key, (fan_in, fan_out), jnp.float32, -bound, bound)


def _bias_uniform(key, fan_in, fan_out):
    bound = 1.0 / math.sqrt(fan_in)
    return jax.random.uniform(key, (1, fan_out), jnp.float32, -bound, bound)


def _block_diag(blocks):
    din = sum(b.shape[0] for b in blocks)
    dout = sum(b.shape[1] for b in blocks)
    out = jnp.zeros((din, dout), jnp.float32)
    ro = co = 0
    for b in blocks:
        out = out.at[ro:ro + b.shape[0], co:co + b.shape[1]].set(b)
        ro += b.shape[0]
        co += b.shape[1]
    return out


def init_params(key, num_agents, state_dim, action_dim, hidden_size):
    N, S, A = num_agents, state_dim, action_dim
    NS = N * S
    dims = [S] + list(hidden_size)
    H_last = hidden_size[-1]

    k_act, k_act_b, k_crit, k_crit_b = jax.random.split(key, 4)

    # BatchNorm params, rows = [gamma_actor, beta_actor, gamma_critic, beta_critic]
    bn = jnp.concatenate([
        jnp.ones((1, NS), jnp.float32), jnp.zeros((1, NS), jnp.float32),
        jnp.ones((1, NS), jnp.float32), jnp.zeros((1, NS), jnp.float32),
    ], axis=0)

    # ---- actor hidden layers: block-diagonal stacks over agents
    actor_hidden = []
    for li in range(len(hidden_size)):
        fan_in, fan_out = dims[li], dims[li + 1]
        kw = jax.random.fold_in(k_act, 10 + li)
        kb = jax.random.fold_in(k_act_b, 10 + li)
        ws = [_xavier_uniform(jax.random.fold_in(kw, a), fan_in, fan_out)
              for a in range(N)]
        bs = [_bias_uniform(jax.random.fold_in(kb, a), fan_in, fan_out)
              for a in range(N)]
        actor_hidden.append((_block_diag(ws), jnp.concatenate(bs, axis=-1)))

    # ---- separate (block-diagonal) mu and log_var heads
    w_mu = _block_diag([_xavier_uniform(
        jax.random.fold_in(jax.random.fold_in(k_act, 100), a), H_last, A)
        for a in range(N)])
    b_mu = jnp.concatenate([_bias_uniform(
        jax.random.fold_in(jax.random.fold_in(k_act_b, 100), a), H_last, A)
        for a in range(N)], axis=-1)
    w_lv = _block_diag([_xavier_uniform(
        jax.random.fold_in(jax.random.fold_in(k_act, 101), a), H_last, A)
        for a in range(N)])
    b_lv = jnp.concatenate([_bias_uniform(
        jax.random.fold_in(jax.random.fold_in(k_act_b, 101), a), H_last, A)
        for a in range(N)], axis=-1)

    # ---- critic
    cdims = [NS] + list(hidden_size)
    critic_hidden = []
    for li in range(len(hidden_size)):
        kw = jax.random.fold_in(k_crit, 10 + li)
        kb = jax.random.fold_in(k_crit_b, 10 + li)
        critic_hidden.append((_xavier_uniform(kw, cdims[li], cdims[li + 1]),
                              _bias_uniform(kb, cdims[li], cdims[li + 1])))
    v_w = _xavier_uniform(jax.random.fold_in(k_crit, 100), cdims[-1], N)
    v_b = _bias_uniform(jax.random.fold_in(k_crit_b, 100), cdims[-1], N)

    return {"bn": bn, "actor_hidden": actor_hidden,
            "w_mu": w_mu, "b_mu": b_mu, "w_lv": w_lv, "b_lv": b_lv,
            "critic_hidden": critic_hidden, "v_w": v_w, "v_b": v_b}


# ----------------------------------------------------------------------------
# Wrapper: one batch-tiled pallas_call for the whole SimpleMAPPOAgent forward
# ----------------------------------------------------------------------------
@partial(jax.jit, static_argnames=("matmul_dtype", "batch_tile"))
def simple_mappo_forward(params, state, noise,
                         matmul_dtype=jnp.float32, batch_tile=256):
    """state: [B, N, S]; noise: [B, N, A] standard-normal (dists.sample()).

    Returns (action [B,N,A], log_prob [B,N,1], entropy [B,N,A], v [B,N]).
    Use matmul_dtype=jnp.bfloat16 on v6e/v7x for MXU-native matmuls (f32 accum).
    """
    B, N, S = state.shape
    A = noise.shape[-1]
    NS, NA = N * S, N * A
    n_hidden = len(params["actor_hidden"])

    x_flat = state.reshape(B, NS).astype(jnp.float32)      # contiguous reshape
    noise_flat = noise.reshape(B, NA).astype(jnp.float32)

    # ---- BatchNorm (training mode, biased var) hoisted to plain XLA and folded
    #      into per-column scale/shift -- full-batch statistics stay correct
    #      under batch tiling.
    mean = jnp.mean(x_flat, axis=0, keepdims=True)
    var = jnp.mean(jnp.square(x_flat - mean), axis=0, keepdims=True)
    inv_std = jax.lax.rsqrt(var + _EPS)
    bn = params["bn"]
    scale_a = bn[0:1] * inv_std
    shift_a = bn[1:2] - mean * scale_a
    scale_c = bn[2:3] * inv_std
    shift_c = bn[3:4] - mean * scale_c
    bn_fold = jnp.concatenate([scale_a, shift_a, scale_c, shift_c], axis=0)

    # per-agent action-dim summation indicator (constant, built host-side)
    sum_mat = (jnp.arange(NA, dtype=jnp.int32)[:, None] // A
               == jnp.arange(N, dtype=jnp.int32)[None, :]).astype(jnp.float32)

    # ---- batch tiling / padding (tile must be a multiple of 8)
    batch_tile = max(8, _round_up(batch_tile, 8))
    B_pad = _round_up(B, 8)
    if B_pad <= batch_tile:
        tb = B_pad
    else:
        tb = batch_tile
        B_pad = _round_up(B_pad, tb)
    if B_pad != B:
        x_flat = jnp.pad(x_flat, ((0, B_pad - B), (0, 0)))
        noise_flat = jnp.pad(noise_flat, ((0, B_pad - B), (0, 0)))
    grid = (B_pad // tb,)

    # ---- assemble inputs + specs: batch-tiled data, resident weights
    inputs = [x_flat, noise_flat]
    in_specs = [pl.BlockSpec((tb, NS), lambda i: (i, 0)),
                pl.BlockSpec((tb, NA), lambda i: (i, 0))]

    def add_const(arr):
        inputs.append(arr)
        in_specs.append(pl.BlockSpec(arr.shape, lambda i: (0, 0)))

    add_const(bn_fold)
    add_const(sum_mat)
    for w, b in params["actor_hidden"]:
        add_const(w.astype(matmul_dtype)); add_const(b)
    add_const(params["w_mu"].astype(matmul_dtype)); add_const(params["b_mu"])
    add_const(params["w_lv"].astype(matmul_dtype)); add_const(params["b_lv"])
    for w, b in params["critic_hidden"]:
        add_const(w.astype(matmul_dtype)); add_const(b)
    add_const(params["v_w"].astype(matmul_dtype)); add_const(params["v_b"])

    out_shape = (jax.ShapeDtypeStruct((B_pad, NA), jnp.float32),   # action
                 jax.ShapeDtypeStruct((B_pad, NA), jnp.float32),   # entropy
                 jax.ShapeDtypeStruct((B_pad, N), jnp.float32),    # log_prob
                 jax.ShapeDtypeStruct((B_pad, N), jnp.float32))    # v
    out_specs = (pl.BlockSpec((tb, NA), lambda i: (i, 0)),
                 pl.BlockSpec((tb, NA), lambda i: (i, 0)),
                 pl.BlockSpec((tb, N), lambda i: (i, 0)),
                 pl.BlockSpec((tb, N), lambda i: (i, 0)))

    # ---- scoped VMEM sized to the actual resident set (+ double buffering)
    def _nbytes(a):
        return int(a.size) * jnp.dtype(a.dtype).itemsize
    const_bytes = sum(_nbytes(a) for a in inputs[2:])
    tile_bytes = 4 * tb * (NS + 3 * NA + 2 * N)            # f32 in/out tiles
    vmem_limit = int(min(48 * 2**20,
                         max(16 * 2**20,
                             2 * const_bytes + 2 * tile_bytes + (2 << 20))))

    action_p, entropy_p, logp_p, v_p = pl.pallas_call(
        make_fused_kernel(n_hidden, N, A, matmul_dtype),
        grid=grid,
        out_shape=out_shape,
        in_specs=in_specs,
        out_specs=out_specs,
        compiler_params=pltpu.CompilerParams(
            dimension_semantics=("parallel",),           # megacore on v7x
            vmem_limit_bytes=vmem_limit),
    )(*inputs)

    action = action_p[:B].reshape(B, N, A)
    entropy = entropy_p[:B].reshape(B, N, A)
    log_prob = logp_p[:B].reshape(B, N, 1)
    v = v_p[:B]
    return action, log_prob, entropy, v


# ----------------------------------------------------------------------------
if __name__ == "__main__":
    N, S, A = 3, 16, 4
    hidden_size = (32, 32)

    key = jax.random.PRNGKey(0)
    k_param, k_state, k_noise = jax.random.split(key, 3)
    params = init_params(k_param, N, S, A, hidden_size)

    # --- small run, f32 parity path (single batch tile) ---
    B = 8
    state = jax.random.normal(k_state, (B, N, S), jnp.float32)
    noise = jax.random.normal(k_noise, (B, N, A), jnp.float32)
    action, log_prob, entropy, v = simple_mappo_forward(params, state, noise)
    jax.block_until_ready((action, log_prob, entropy, v))
    assert action.shape == (B, N, A)
    assert log_prob.shape == (B, N, 1)
    assert entropy.shape == (B, N, A)
    assert v.shape == (B, N)
    for t in (action, log_prob, entropy, v):
        assert bool(jnp.all(jnp.isfinite(t)))

    # --- larger run exercising the batch grid (multiple tiles, padding) and
    #     the bf16 matmul path recommended for v6e/v7x ---
    B2 = 300
    k_state2, k_noise2 = jax.random.split(jax.random.PRNGKey(1))
    state2 = jax.random.normal(k_state2, (B2, N, S), jnp.float32)
    noise2 = jax.random.normal(k_noise2, (B2, N, A), jnp.float32)
    a2, lp2, e2, v2 = simple_mappo_forward(params, state2, noise2,
                                           matmul_dtype=jnp.bfloat16,
                                           batch_tile=128)
    jax.block_until_ready((a2, lp2, e2, v2))
    assert a2.shape == (B2, N, A)
    assert lp2.shape == (B2, N, 1)
    assert e2.shape == (B2, N, A)
    assert v2.shape == (B2, N)
    for t in (a2, lp2, e2, v2):
        assert bool(jnp.all(jnp.isfinite(t)))

    print("KERNEL_OK")
</pallas_src>

<mosaic_0001>
module attributes {stable_mosaic.version = 11 : i64} {
  func.func @kernel(%arg0: i32, %arg1: memref<8x48xf32, #tpu.memory_space<vmem>>, %arg2: memref<8x12xf32, #tpu.memory_space<vmem>>, %arg3: memref<4x48xf32, #tpu.memory_space<vmem>>, %arg4: memref<12x3xf32, #tpu.memory_space<vmem>>, %arg5: memref<48x96xf32, #tpu.memory_space<vmem>>, %arg6: memref<1x96xf32, #tpu.memory_space<vmem>>, %arg7: memref<96x96xf32, #tpu.memory_space<vmem>>, %arg8: memref<1x96xf32, #tpu.memory_space<vmem>>, %arg9: memref<96x12xf32, #tpu.memory_space<vmem>>, %arg10: memref<1x12xf32, #tpu.memory_space<vmem>>, %arg11: memref<96x12xf32, #tpu.memory_space<vmem>>, %arg12: memref<1x12xf32, #tpu.memory_space<vmem>>, %arg13: memref<48x32xf32, #tpu.memory_space<vmem>>, %arg14: memref<1x32xf32, #tpu.memory_space<vmem>>, %arg15: memref<32x32xf32, #tpu.memory_space<vmem>>, %arg16: memref<1x32xf32, #tpu.memory_space<vmem>>, %arg17: memref<32x3xf32, #tpu.memory_space<vmem>>, %arg18: memref<1x3xf32, #tpu.memory_space<vmem>>, %arg19: memref<8x12xf32, #tpu.memory_space<vmem>>, %arg20: memref<8x12xf32, #tpu.memory_space<vmem>>, %arg21: memref<8x3xf32, #tpu.memory_space<vmem>>, %arg22: memref<8x3xf32, #tpu.memory_space<vmem>>) attributes {dimension_semantics = [#tpu.dimension_semantics<parallel>], iteration_bounds = array<i64: 1>, scalar_prefetch = 0 : i64, scratch_operands = 0 : i64, tpu.core_type = #tpu.core_type<tc>, window_params = [{transform_indices = @transform_0, window_bounds = array<i64: 8, 48>}, {transform_indices = @transform_1, window_bounds = array<i64: 8, 12>}, {pipeline_mode = #tpu.pipeline_mode<synchronous>, transform_indices = @transform_2, window_bounds = array<i64: 4, 48>}, {pipeline_mode = #tpu.pipeline_mode<synchronous>, transform_indices = @transform_3, window_bounds = array<i64: 12, 3>}, {pipeline_mode = #tpu.pipeline_mode<synchronous>, transform_indices = @transform_4, window_bounds = array<i64: 48, 96>}, {pipeline_mode = #tpu.pipeline_mode<synchronous>, transform_indices = @transform_5, window_bounds = array<i64: 1, 96>}, {pipeline_mode = #tpu.pipeline_mode<synchronous>, transform_indices = @transform_6, window_bounds = array<i64: 96, 96>}, {pipeline_mode = #tpu.pipeline_mode<synchronous>, transform_indices = @transform_7, window_bounds = array<i64: 1, 96>}, {pipeline_mode = #tpu.pipeline_mode<synchronous>, transform_indices = @transform_8, window_bounds = array<i64: 96, 12>}, {pipeline_mode = #tpu.pipeline_mode<synchronous>, transform_indices = @transform_9, window_bounds = array<i64: 1, 12>}, {pipeline_mode = #tpu.pipeline_mode<synchronous>, transform_indices = @transform_10, window_bounds = array<i64: 96, 12>}, {pipeline_mode = #tpu.pipeline_mode<synchronous>, transform_indices = @transform_11, window_bounds = array<i64: 1, 12>}, {pipeline_mode = #tpu.pipeline_mode<synchronous>, transform_indices = @transform_12, window_bounds = array<i64: 48, 32>}, {pipeline_mode = #tpu.pipeline_mode<synchronous>, transform_indices = @transform_13, window_bounds = array<i64: 1, 32>}, {pipeline_mode = #tpu.pipeline_mode<synchronous>, transform_indices = @transform_14, window_bounds = array<i64: 32, 32>}, {pipeline_mode = #tpu.pipeline_mode<synchronous>, transform_indices = @transform_15, window_bounds = array<i64: 1, 32>}, {pipeline_mode = #tpu.pipeline_mode<synchronous>, transform_indices = @transform_16, window_bounds = array<i64: 32, 3>}, {pipeline_mode = #tpu.pipeline_mode<synchronous>, transform_indices = @transform_17, window_bounds = array<i64: 1, 3>}, {transform_indices = @transform_18, window_bounds = array<i64: 8, 12>}, {transform_indices = @transform_19, window_bounds = array<i64: 8, 12>}, {transform_indices = @transform_20, window_bounds = array<i64: 8, 3>}, {transform_indices = @transform_21, window_bounds = array<i64: 8, 3>}]} {
    %c0 = arith.constant 0 : index
    %c0_0 = arith.constant 0 : index
    %0 = vector.load %arg1[%c0, %c0_0] : memref<8x48xf32, #tpu.memory_space<vmem>>, vector<8x48xf32>
    %c0_1 = arith.constant 0 : index
    %c0_2 = arith.constant 0 : index
    %1 = vector.load %arg3[%c0_1, %c0_2] : memref<4x48xf32, #tpu.memory_space<vmem>>, vector<4x48xf32>
    %2 = vector.extract_strided_slice %1 {offsets = [0, 0], sizes = [1, 48], strides = [1, 1]} : vector<4x48xf32> to vector<1x48xf32>
    %3 = vector.broadcast %2 : vector<1x48xf32> to vector<8x48xf32>
    %4 = arith.mulf %0, %3 : vector<8x48xf32>
    %5 = vector.extract_strided_slice %1 {offsets = [1, 0], sizes = [1, 48], strides = [1, 1]} : vector<4x48xf32> to vector<1x48xf32>
    %6 = vector.broadcast %5 : vector<1x48xf32> to vector<8x48xf32>
    %7 = arith.addf %4, %6 : vector<8x48xf32>
    %8 = vector.extract_strided_slice %1 {offsets = [2, 0], sizes = [1, 48], strides = [1, 1]} : vector<4x48xf32> to vector<1x48xf32>
    %9 = vector.broadcast %8 : vector<1x48xf32> to vector<8x48xf32>
    %10 = arith.mulf %0, %9 : vector<8x48xf32>
    %11 = vector.extract_strided_slice %1 {offsets = [3, 0], sizes = [1, 48], strides = [1, 1]} : vector<4x48xf32> to vector<1x48xf32>
    %12 = vector.broadcast %11 : vector<1x48xf32> to vector<8x48xf32>
    %13 = arith.addf %10, %12 : vector<8x48xf32>
    %c0_3 = arith.constant 0 : index
    %c0_4 = arith.constant 0 : index
    %14 = vector.load %arg5[%c0_3, %c0_4] : memref<48x96xf32, #tpu.memory_space<vmem>>, vector<48x96xf32>
    %c0_5 = arith.constant 0 : index
    %c0_6 = arith.constant 0 : index
    %15 = vector.load %arg6[%c0_5, %c0_6] : memref<1x96xf32, #tpu.memory_space<vmem>>, vector<1x96xf32>
    %cst = arith.constant dense<0.000000e+00> : vector<8x96xf32>
    %16 = tpu.matmul %7, %14, %cst {dimension_numbers = #tpu.dot_dimension_numbers<[1], [0], [0], [1], [0, 0, 1, 1], [], []>} : vector<8x48xf32>, vector<48x96xf32>, vector<8x96xf32> -> vector<8x96xf32>
    %17 = vector.broadcast %15 : vector<1x96xf32> to vector<8x96xf32>
    %18 = arith.addf %16, %17 : vector<8x96xf32>
    %cst_7 = arith.constant 0.000000e+00 : f32
    %19 = vector.broadcast %cst_7 : f32 to vector<8x96xf32>
    %20 = arith.maximumf %18, %19 : vector<8x96xf32>
    %c0_8 = arith.constant 0 : index
    %c0_9 = arith.constant 0 : index
    %21 = vector.load %arg7[%c0_8, %c0_9] : memref<96x96xf32, #tpu.memory_space<vmem>>, vector<96x96xf32>
    %c0_10 = arith.constant 0 : index
    %c0_11 = arith.constant 0 : index
    %22 = vector.load %arg8[%c0_10, %c0_11] : memref<1x96xf32, #tpu.memory_space<vmem>>, vector<1x96xf32>
    %cst_12 = arith.constant dense<0.000000e+00> : vector<8x96xf32>
    %23 = tpu.matmul %20, %21, %cst_12 {dimension_numbers = #tpu.dot_dimension_numbers<[1], [0], [0], [1], [0, 0, 1, 1], [], []>} : vector<8x96xf32>, vector<96x96xf32>, vector<8x96xf32> -> vector<8x96xf32>
    %24 = vector.broadcast %22 : vector<1x96xf32> to vector<8x96xf32>
    %25 = arith.addf %23, %24 : vector<8x96xf32>
    %cst_13 = arith.constant 0.000000e+00 : f32
    %26 = vector.broadcast %cst_13 : f32 to vector<8x96xf32>
    %27 = arith.maximumf %25, %26 : vector<8x96xf32>
    %c0_14 = arith.constant 0 : index
    %c0_15 = arith.constant 0 : index
    %28 = vector.load %arg9[%c0_14, %c0_15] : memref<96x12xf32, #tpu.memory_space<vmem>>, vector<96x12xf32>
    %cst_16 = arith.constant dense<0.000000e+00> : vector<8x12xf32>
    %29 = tpu.matmul %27, %28, %cst_16 {dimension_numbers = #tpu.dot_dimension_numbers<[1], [0], [0], [1], [0, 0, 1, 1], [], []>} : vector<8x96xf32>, vector<96x12xf32>, vector<8x12xf32> -> vector<8x12xf32>
    %c0_17 = arith.constant 0 : index
    %c0_18 = arith.constant 0 : index
    %30 = vector.load %arg10[%c0_17, %c0_18] : memref<1x12xf32, #tpu.memory_space<vmem>>, vector<1x12xf32>
    %31 = vector.broadcast %30 : vector<1x12xf32> to vector<8x12xf32>
    %32 = arith.addf %29, %31 : vector<8x12xf32>
    %33 = math.tanh %32 : vector<8x12xf32>
    %c0_19 = arith.constant 0 : index
    %c0_20 = arith.constant 0 : index
    %34 = vector.load %arg11[%c0_19, %c0_20] : memref<96x12xf32, #tpu.memory_space<vmem>>, vector<96x12xf32>
    %cst_21 = arith.constant dense<0.000000e+00> : vector<8x12xf32>
    %35 = tpu.matmul %27, %34, %cst_21 {dimension_numbers = #tpu.dot_dimension_numbers<[1], [0], [0], [1], [0, 0, 1, 1], [], []>} : vector<8x96xf32>, vector<96x12xf32>, vector<8x12xf32> -> vector<8x12xf32>
    %c0_22 = arith.constant 0 : index
    %c0_23 = arith.constant 0 : index
    %36 = vector.load %arg12[%c0_22, %c0_23] : memref<1x12xf32, #tpu.memory_space<vmem>>, vector<1x12xf32>
    %37 = vector.broadcast %36 : vector<1x12xf32> to vector<8x12xf32>
    %38 = arith.addf %35, %37 : vector<8x12xf32>
    %cst_24 = arith.constant 0.000000e+00 : f32
    %39 = vector.broadcast %cst_24 : f32 to vector<8x12xf32>
    %40 = arith.maximumf %38, %39 : vector<8x12xf32>
    %cst_25 = arith.constant 0.000000e+00 : f32
    %41 = vector.broadcast %cst_25 : f32 to vector<8x12xf32>
    %42 = arith.subf %41, %40 : vector<8x12xf32>
    %cst_26 = arith.constant 5.000000e-01 : f32
    %43 = vector.broadcast %cst_26 : f32 to vector<8x12xf32>
    %44 = arith.mulf %43, %42 : vector<8x12xf32>
    %45 = math.exp %44 : vector<8x12xf32>
    %c0_27 = arith.constant 0 : index
    %c0_28 = arith.constant 0 : index
    %46 = vector.load %arg2[%c0_27, %c0_28] : memref<8x12xf32, #tpu.memory_space<vmem>>, vector<8x12xf32>
    %47 = arith.mulf %45, %46 : vector<8x12xf32>
    %48 = arith.addf %33, %47 : vector<8x12xf32>
    %c0_29 = arith.constant 0 : index
    %c0_30 = arith.constant 0 : index
    %49 = vector.load %arg19[%c0_29, %c0_30] : memref<8x12xf32, #tpu.memory_space<vmem>>, vector<8x12xf32>
    tpu.vector_store %arg19[%c0_29, %c0_30], %48 {strides = array<i32>} : memref<8x12xf32, #tpu.memory_space<vmem>>, vector<8x12xf32>,
    %cst_31 = arith.constant 5.000000e-01 : f32
    %50 = vector.broadcast %cst_31 : f32 to vector<8x12xf32>
    %51 = arith.mulf %50, %42 : vector<8x12xf32>
    %cst_32 = arith.constant 1.41893852 : f32
    %52 = vector.broadcast %cst_32 : f32 to vector<8x12xf32>
    %53 = arith.addf %52, %51 : vector<8x12xf32>
    %c0_33 = arith.constant 0 : index
    %c0_34 = arith.constant 0 : index
    %54 = vector.load %arg20[%c0_33, %c0_34] : memref<8x12xf32, #tpu.memory_space<vmem>>, vector<8x12xf32>
    tpu.vector_store %arg20[%c0_33, %c0_34], %53 {strides = array<i32>} : memref<8x12xf32, #tpu.memory_space<vmem>>, vector<8x12xf32>,
    %55 = arith.mulf %46, %46 : vector<8x12xf32>
    %cst_35 = arith.constant -5.000000e-01 : f32
    %56 = vector.broadcast %cst_35 : f32 to vector<8x12xf32>
    %57 = arith.mulf %56, %55 : vector<8x12xf32>
    %cst_36 = arith.constant 5.000000e-01 : f32
    %58 = vector.broadcast %cst_36 : f32 to vector<8x12xf32>
    %59 = arith.mulf %58, %42 : vector<8x12xf32>
    %60 = arith.subf %57, %59 : vector<8x12xf32>
    %c0_37 = arith.constant 0 : index
    %c0_38 = arith.constant 0 : index
    %61 = vector.load %arg4[%c0_37, %c0_38] : memref<12x3xf32, #tpu.memory_space<vmem>>, vector<12x3xf32>
    %cst_39 = arith.constant dense<0.000000e+00> : vector<8x3xf32>
    %62 = tpu.matmul %60, %61, %cst_39 {dimension_numbers = #tpu.dot_dimension_numbers<[1], [0], [0], [1], [0, 0, 1, 1], [], []>} : vector<8x12xf32>, vector<12x3xf32>, vector<8x3xf32> -> vector<8x3xf32>
    %cst_40 = arith.constant 3.67575407 : f32
    %63 = vector.broadcast %cst_40 : f32 to vector<8x3xf32>
    %64 = arith.subf %62, %63 : vector<8x3xf32>
    %c0_41 = arith.constant 0 : index
    %c0_42 = arith.constant 0 : index
    %65 = vector.load %arg21[%c0_41, %c0_42] : memref<8x3xf32, #tpu.memory_space<vmem>>, vector<8x3xf32>
    tpu.vector_store %arg21[%c0_41, %c0_42], %64 {strides = array<i32>} : memref<8x3xf32, #tpu.memory_space<vmem>>, vector<8x3xf32>,
    %c0_43 = arith.constant 0 : index
    %c0_44 = arith.constant 0 : index
    %66 = vector.load %arg13[%c0_43, %c0_44] : memref<48x32xf32, #tpu.memory_space<vmem>>, vector<48x32xf32>
    %c0_45 = arith.constant 0 : index
    %c0_46 = arith.constant 0 : index
    %67 = vector.load %arg14[%c0_45, %c0_46] : memref<1x32xf32, #tpu.memory_space<vmem>>, vector<1x32xf32>
    %cst_47 = arith.constant dense<0.000000e+00> : vector<8x32xf32>
    %68 = tpu.matmul %13, %66, %cst_47 {dimension_numbers = #tpu.dot_dimension_numbers<[1], [0], [0], [1], [0, 0, 1, 1], [], []>} : vector<8x48xf32>, vector<48x32xf32>, vector<8x32xf32> -> vector<8x32xf32>
    %69 = vector.broadcast %67 : vector<1x32xf32> to vector<8x32xf32>
    %70 = arith.addf %68, %69 : vector<8x32xf32>
    %cst_48 = arith.constant 0.000000e+00 : f32
    %71 = vector.broadcast %cst_48 : f32 to vector<8x32xf32>
    %72 = arith.maximumf %70, %71 : vector<8x32xf32>
    %c0_49 = arith.constant 0 : index
    %c0_50 = arith.constant 0 : index
    %73 = vector.load %arg15[%c0_49, %c0_50] : memref<32x32xf32, #tpu.memory_space<vmem>>, vector<32x32xf32>
    %c0_51 = arith.constant 0 : index
    %c0_52 = arith.constant 0 : index
    %74 = vector.load %arg16[%c0_51, %c0_52] : memref<1x32xf32, #tpu.memory_space<vmem>>, vector<1x32xf32>
    %cst_53 = arith.constant dense<0.000000e+00> : vector<8x32xf32>
    %75 = tpu.matmul %72, %73, %cst_53 {dimension_numbers = #tpu.dot_dimension_numbers<[1], [0], [0], [1], [0, 0, 1, 1], [], []>} : vector<8x32xf32>, vector<32x32xf32>, vector<8x32xf32> -> vector<8x32xf32>
    %76 = vector.broadcast %74 : vector<1x32xf32> to vector<8x32xf32>
    %77 = arith.addf %75, %76 : vector<8x32xf32>
    %cst_54 = arith.constant 0.000000e+00 : f32
    %78 = vector.broadcast %cst_54 : f32 to vector<8x32xf32>
    %79 = arith.maximumf %77, %78 : vector<8x32xf32>
    %c0_55 = arith.constant 0 : index
    %c0_56 = arith.constant 0 : index
    %80 = vector.load %arg17[%c0_55, %c0_56] : memref<32x3xf32, #tpu.memory_space<vmem>>, vector<32x3xf32>
    %cst_57 = arith.constant dense<0.000000e+00> : vector<8x3xf32>
    %81 = tpu.matmul %79, %80, %cst_57 {dimension_numbers = #tpu.dot_dimension_numbers<[1], [0], [0], [1], [0, 0, 1, 1], [], []>} : vector<8x32xf32>, vector<32x3xf32>, vector<8x3xf32> -> vector<8x3xf32>
    %c0_58 = arith.constant 0 : index
    %c0_59 = arith.constant 0 : index
    %82 = vector.load %arg18[%c0_58, %c0_59] : memref<1x3xf32, #tpu.memory_space<vmem>>, vector<1x3xf32>
    %83 = vector.broadcast %82 : vector<1x3xf32> to vector<8x3xf32>
    %84 = arith.addf %81, %83 : vector<8x3xf32>
    %c0_60 = arith.constant 0 : index
    %c0_61 = arith.constant 0 : index
    %85 = vector.load %arg22[%c0_60, %c0_61] : memref<8x3xf32, #tpu.memory_space<vmem>>, vector<8x3xf32>
    tpu.vector_store %arg22[%c0_60, %c0_61], %84 {strides = array<i32>} : memref<8x3xf32, #tpu.memory_space<vmem>>, vector<8x3xf32>,
    return
  }
  func.func @transform_0(%arg0: i32) -> (i32, i32) {
    %c0_i32 = arith.constant 0 : i32
    %c0_i32_0 = arith.constant 0 : i32
    return %arg0, %c0_i32 : i32, i32
  }
  func.func @transform_1(%arg0: i32) -> (i32, i32) {
    %c0_i32 = arith.constant 0 : i32
    %c0_i32_0 = arith.constant 0 : i32
    return %arg0, %c0_i32 : i32, i32
  }
  func.func @transform_2(%arg0: i32) -> (i32, i32) {
    %c0_i32 = arith.constant 0 : i32
    %c0_i32_0 = arith.constant 0 : i32
    %c0_i32_1 = arith.constant 0 : i32
    return %c0_i32, %c0_i32_0 : i32, i32
  }
  func.func @transform_3(%arg0: i32) -> (i32, i32) {
    %c0_i32 = arith.constant 0 : i32
    %c0_i32_0 = arith.constant 0 : i32
    %c0_i32_1 = arith.constant 0 : i32
    return %c0_i32, %c0_i32_0 : i32, i32
  }
  func.func @transform_4(%arg0: i32) -> (i32, i32) {
    %c0_i32 = arith.constant 0 : i32
    %c0_i32_0 = arith.constant 0 : i32
    %c0_i32_1 = arith.constant 0 : i32
    return %c0_i32, %c0_i32_0 : i32, i32
  }
  func.func @transform_5(%arg0: i32) -> (i32, i32) {
    %c0_i32 = arith.constant 0 : i32
    %c0_i32_0 = arith.constant 0 : i32
    %c0_i32_1 = arith.constant 0 : i32
    return %c0_i32, %c0_i32_0 : i32, i32
  }
  func.func @transform_6(%arg0: i32) -> (i32, i32) {
    %c0_i32 = arith.constant 0 : i32
    %c0_i32_0 = arith.constant 0 : i32
    %c0_i32_1 = arith.constant 0 : i32
    return %c0_i32, %c0_i32_0 : i32, i32
  }
  func.func @transform_7(%arg0: i32) -> (i32, i32) {
    %c0_i32 = arith.constant 0 : i32
    %c0_i32_0 = arith.constant 0 : i32
    %c0_i32_1 = arith.constant 0 : i32
    return %c0_i32, %c0_i32_0 : i32, i32
  }
  func.func @transform_8(%arg0: i32) -> (i32, i32) {
    %c0_i32 = arith.constant 0 : i32
    %c0_i32_0 = arith.constant 0 : i32
    %c0_i32_1 = arith.constant 0 : i32
    return %c0_i32, %c0_i32_0 : i32, i32
  }
  func.func @transform_9(%arg0: i32) -> (i32, i32) {
    %c0_i32 = arith.constant 0 : i32
    %c0_i32_0 = arith.constant 0 : i32
    %c0_i32_1 = arith.constant 0 : i32
    return %c0_i32, %c0_i32_0 : i32, i32
  }
  func.func @transform_10(%arg0: i32) -> (i32, i32) {
    %c0_i32 = arith.constant 0 : i32
    %c0_i32_0 = arith.constant 0 : i32
    %c0_i32_1 = arith.constant 0 : i32
    return %c0_i32, %c0_i32_0 : i32, i32
  }
  func.func @transform_11(%arg0: i32) -> (i32, i32) {
    %c0_i32 = arith.constant 0 : i32
    %c0_i32_0 = arith.constant 0 : i32
    %c0_i32_1 = arith.constant 0 : i32
    return %c0_i32, %c0_i32_0 : i32, i32
  }
  func.func @transform_12(%arg0: i32) -> (i32, i32) {
    %c0_i32 = arith.constant 0 : i32
    %c0_i32_0 = arith.constant 0 : i32
    %c0_i32_1 = arith.constant 0 : i32
    return %c0_i32, %c0_i32_0 : i32, i32
  }
  func.func @transform_13(%arg0: i32) -> (i32, i32) {
    %c0_i32 = arith.constant 0 : i32
    %c0_i32_0 = arith.constant 0 : i32
    %c0_i32_1 = arith.constant 0 : i32
    return %c0_i32, %c0_i32_0 : i32, i32
  }
  func.func @transform_14(%arg0: i32) -> (i32, i32) {
    %c0_i32 = arith.constant 0 : i32
    %c0_i32_0 = arith.constant 0 : i32
    %c0_i32_1 = arith.constant 0 : i32
    return %c0_i32, %c0_i32_0 : i32, i32
  }
  func.func @transform_15(%arg0: i32) -> (i32, i32) {
    %c0_i32 = arith.constant 0 : i32
    %c0_i32_0 = arith.constant 0 : i32
    %c0_i32_1 = arith.constant 0 : i32
    return %c0_i32, %c0_i32_0 : i32, i32
  }
  func.func @transform_16(%arg0: i32) -> (i32, i32) {
    %c0_i32 = arith.constant 0 : i32
    %c0_i32_0 = arith.constant 0 : i32
    %c0_i32_1 = arith.constant 0 : i32
    return %c0_i32, %c0_i32_0 : i32, i32
  }
  func.func @transform_17(%arg0: i32) -> (i32, i32) {
    %c0_i32 = arith.constant 0 : i32
    %c0_i32_0 = arith.constant 0 : i32
    %c0_i32_1 = arith.constant 0 : i32
    return %c0_i32, %c0_i32_0 : i32, i32
  }
  func.func @transform_18(%arg0: i32) -> (i32, i32) {
    %c0_i32 = arith.constant 0 : i32
    %c0_i32_0 = arith.constant 0 : i32
    return %arg0, %c0_i32 : i32, i32
  }
  func.func @transform_19(%arg0: i32) -> (i32, i32) {
    %c0_i32 = arith.constant 0 : i32
    %c0_i32_0 = arith.constant 0 : i32
    return %arg0, %c0_i32 : i32, i32
  }
  func.func @transform_20(%arg0: i32) -> (i32, i32) {
    %c0_i32 = arith.constant 0 : i32
    %c0_i32_0 = arith.constant 0 : i32
    return %arg0, %c0_i32 : i32, i32
  }
  func.func @transform_21(%arg0: i32) -> (i32, i32) {
    %c0_i32 = arith.constant 0 : i32
    %c0_i32_0 = arith.constant 0 : i32
    return %arg0, %c0_i32 : i32, i32
  }
}

</mosaic_0001>

<bundles_post_ra>
// kernel: simple_mappo_forward.1
= control target key start
LH: loop header
LB: loop body
LE: loop exit
PB: predicated region body
PF: predicated region fallthrough
CT: control target
= control target key end

     0   :  { %v65_v0 = vlaneseq  ;;  %v1049_v1 = vmov 0.0   ;;  %vm1050_vm0 = vmmov 0   ;;  %vm98_vm1 = vcmask 392192   ;;  %s1479_s4 = inlined_call_operand.vmem [shape: f32[48,96], index: 4, kind: input, shape index: {}]   ;;  %s1480_s2 = inlined_call_operand.vmem [shape: f32[4,48], index: 2, kind: input, shape index: {}]   ;;  %s1481_s6 = inlined_call_operand.vmem [shape: f32[96,96], index: 6, kind: input, shape index: {}]   ;;  %s1482_s0 = inlined_call_operand.vmem [shape: f32[8,48], index: 0, kind: input, shape index: {}]   ;;  %s1483_s8 = inlined_call_operand.vmem [shape: f32[96,12], index: 8, kind: input, shape index: {}]   ;;  %s1484_s5 = inlined_call_operand.vmem [shape: f32[1,96], index: 5, kind: input, shape index: {}]   ;;  %s1485_s10 = inlined_call_operand.vmem [shape: f32[96,12], index: 10, kind: input, shape index: {}]   ;;  %s1486_s7 = inlined_call_operand.vmem [shape: f32[1,96], index: 7, kind: input, shape index: {}]   ;;  %s1487_s3 = inlined_call_operand.vmem [shape: f32[12,3], index: 3, kind: input, shape index: {}]   ;;  %s1488_s1 = inlined_call_operand.vmem [shape: f32[8,12], index: 1, kind: input, shape index: {}]   ;;  %s1489_s11 = inlined_call_operand.vmem [shape: f32[1,12], index: 11, kind: input, shape index: {}]   ;;  %s1490_s9 = inlined_call_operand.vmem [shape: f32[1,12], index: 9, kind: input, shape index: {}]   ;;  %s1491_s12 = inlined_call_operand.vmem [shape: f32[48,32], index: 12, kind: input, shape index: {}]   ;;  %s1492_s19 = inlined_call_operand.vmem [shape: f32[8,12], index: 19, kind: output, shape index: {1}]   ;;  %s1493_s18 = inlined_call_operand.vmem [shape: f32[8,12], index: 18, kind: output, shape index: {0}]   ;;  %s1494_s14 = inlined_call_operand.vmem [shape: f32[32,32], index: 14, kind: input, shape index: {}]   ;;  %s1495_s16 = inlined_call_operand.vmem [shape: f32[32,3], index: 16, kind: input, shape index: {}]   ;;  %s1496_s20 = inlined_call_operand.vmem [shape: f32[8,3], index: 20, kind: output, shape index: {2}]   ;;  %s1497_s13 = inlined_call_operand.vmem [shape: f32[1,32], index: 13, kind: input, shape index: {}]   ;;  %s1498_s15 = inlined_call_operand.vmem [shape: f32[1,32], index: 15, kind: input, shape index: {}]   ;;  %s1499_s17 = inlined_call_operand.vmem [shape: f32[1,3], index: 17, kind: input, shape index: {}]   ;;  %s1500_s21 = inlined_call_operand.vmem [shape: f32[8,3], index: 21, kind: output, shape index: {3}]  }
   0x1   :  { %1504 = sst [smem:[#allocation2_spill]] %s1479_s4  ;;  %903 = vmatprep.subr.mxu0 %v1049_v1  ;;  %915 = vmatprep.mubr.msk.f32.mxu0 %vm1050_vm0, %v1049_v1  ;;  %vm192_vm2 = vcmask 785408   ;;  %v371_v43 = vld [vmem:[%s1485_s10 + $0x58] sm:$0xff]  ;;  %v370_v44 = vld [vmem:[%s1485_s10 + $0x50] sm:$0xff]  ;;  %v369_v45 = vld [vmem:[%s1485_s10 + $0x48] sm:$0xff]  ;;  %vm469_vm3 = vcmask 1043456  }
   0x2   :  { %1505 = sst [smem:[#allocation3_spill]] %s1480_s2  ;;  %v1170_v4 = vshrl.u32 %v65_v0, 7  ;;  %918 = vmatprep.subr.mxu1 %v1049_v1  ;;  %942 = vmatprep.mubr.msk.f32.mxu1 %vm1050_vm0, %v1049_v1  ;;  %v368_v46 = vld [vmem:[%s1485_s10 + $0x40] sm:$0xff]  ;;  %v367_v47 = vld [vmem:[%s1485_s10 + $0x38] sm:$0xff]  ;;  %v366_v48 = vld [vmem:[%s1485_s10 + $0x30] sm:$0xff]  ;;  %vm457_vm4 = vcmask 97280  }
   0x3   :  { %1506 = sst [smem:[#allocation4_spill]] %s1481_s6  ;;  %v365_v49 = vld [vmem:[%s1485_s10 + $0x28] sm:$0xff]  ;;  %v364_v50 = vld [vmem:[%s1485_s10 + $0x20] sm:$0xff]  ;;  %v363_v51 = vld [vmem:[%s1485_s10 + $0x18] sm:$0xff]  ;;  %vm544_vm5 = vcmask 23552   ;;  %vm644_vm6 = vcmask 261120  }
   0x4   :  { %1507 = sst [smem:[#allocation5_spill]] %s1482_s0  ;;  %v67_v8 = vsub.s32 0, %v1170_v4  ;;  %v72_v9 = vsub.s32 1, %v1170_v4  ;;  %v362_v53 = vld [vmem:[%s1485_s10 + $0x10] sm:$0xff]  ;;  %v361_v55 = vld [vmem:[%s1485_s10 + $0x8] sm:$0xff]  ;;  %v360_v57 = vld [vmem:[%s1485_s10] sm:$0xff] }
   0x5   :  { %1508 = sst [smem:[#allocation6_spill]] %s1483_s8  ;;  %v822_v58 = vld [vmem:[%s1486_s7] ss:$0 sm:$0xff]  ;;  %v465_v63 = vld [vmem:[%s1487_s3 + $0x8] sm:$0xf] }
   0x6   :  { %1509 = sst [smem:[#allocation7_spill]] %s1484_s5  ;;  %v464_v0 = vld [vmem:[%s1487_s3] sm:$0xff] }
   0x7   :  { %s1510_s26 = sld [smem:[#allocation2_spill]] }
   0x8   :  { %s1511_s30 = sld [smem:[#allocation3_spill]] }
   0x9   :  { %s1512_s23 = sld [smem:[#allocation4_spill]] }
   0xa   :  { %s1513_s28 = sld [smem:[#allocation5_spill]] }
   0xd   :  { %v90_v2 = vld [vmem:[%s1510_s26 + $0x28] sm:$0xff]  ;;  %v89_v3 = vld [vmem:[%s1510_s26 + $0x20] sm:$0xff]  ;;  %v88_v5 = vld [vmem:[%s1510_s26 + $0x18] sm:$0xff] }
   0xe   :  { %904 = vmatpush3.msra.mxu0 %v90_v2  ;;  %v1180_v6 = vld [vmem:[%s1511_s30] sm:$0xf]  ;;  %v87_v11 = vld [vmem:[%s1510_s26 + $0x10] sm:$0xff]  ;;  %v86_v16 = vld [vmem:[%s1510_s26 + $0x8] sm:$0xff] }
   0xf   :  { %905 = vmatprep.subr.mxu0 %v1049_v1  ;;  %v184_v7 = vld [vmem:[%s1512_s23 + $0x58] sm:$0xff]  ;;  %v183_v10 = vld [vmem:[%s1512_s23 + $0x50] sm:$0xff]  ;;  %v182_v13 = vld [vmem:[%s1512_s23 + $0x48] sm:$0xff]  ;;  %v68_v14 = vrot.slane %v1180_v6, %v67_v8  ;;  %v73_v15 = vrot.slane %v1180_v6, %v72_v9 }
  0x10   :  { %906 = vmatpush3.msra.mxu0 %v89_v3  ;;  %919 = vmatpush3.msra.mxu1 %v184_v7  ;;  %v1199_v12 = vld [vmem:[%s1513_s28] sm:$0xff]  ;;  %v180_v20 = vld [vmem:[%s1512_s23 + $0x38] sm:$0xff]  ;;  %v179_v22 = vld [vmem:[%s1512_s23 + $0x30] sm:$0xff] }
  0x11   :  { %907 = vmatprep.subr.mxu0 %v1049_v1  ;;  %920 = vmatprep.subr.mxu1 %v1049_v1  ;;  %v181_v17 = vld [vmem:[%s1512_s23 + $0x40] sm:$0xff]  ;;  %v69_v18 = vmul.f32 %v68_v14, %v1199_v12  ;;  %v178_v23 = vld [vmem:[%s1512_s23 + $0x28] sm:$0xff]  ;;  %v176_v25 = vld [vmem:[%s1512_s23 + $0x18] sm:$0xff] }
  0x12   :  { %908 = vmatpush3.msra.mxu0 %v88_v5  ;;  %921 = vmatpush3.msra.mxu1 %v183_v10  ;;  %v85_v19 = vld [vmem:[%s1510_s26] sm:$0xff]  ;;  %v175_v26 = vld [vmem:[%s1512_s23 + $0x10] sm:$0xff]  ;;  %v174_v27 = vld [vmem:[%s1512_s23 + $0x8] sm:$0xff]  ;;  %s1514_s26 = sld [smem:[#allocation6_spill]] }
  0x13   :  { %909 = vmatprep.subr.mxu0 %v1049_v1  ;;  %922 = vmatprep.subr.mxu1 %v1049_v1  ;;  %v74_v21 = vadd.f32 %v73_v15, %v69_v18  ;;  %v177_v24 = vld [vmem:[%s1512_s23 + $0x20] sm:$0xff] }
  0x14   :  { %910 = vmatpush3.msra.mxu0 %v87_v11  ;;  %923 = vmatpush3.msra.mxu1 %v182_v13  ;;  %v173_v28 = vld [vmem:[%s1512_s23] sm:$0xff]  ;;  %s1515_s23 = sld [smem:[#allocation7_spill]] }
  0x15   :  { %911 = vmatprep.subr.mxu0 %v1049_v1  ;;  %924 = vmatprep.subr.mxu1 %v1049_v1  ;;  %v826_v2 = vld [vmem:[%s1489_s11] ss:$0 sm:$0xff] }
  0x16   :  { %912 = vmatpush3.msra.mxu0 %v86_v16  ;;  %925 = vmatpush3.msra.mxu1 %v181_v17  ;;  %v454_v3 = vld [vmem:[%s1488_s1] sm:$0xff]  ;;  %v77_v17 = vsub.s32 2, %v1170_v4 }
  0x17   :  { %913 = vmatprep.subr.mxu0 %v1049_v1  ;;  %926 = vmatprep.subr.mxu1 %v1049_v1  ;;  %v461_v9 = vmul.f32 %v454_v3, %v454_v3  ;;  %v824_v16 = vld [vmem:[%s1490_s9] ss:$0 sm:$0xff] }
  0x18   :  { %914 = vmatpush3.msra.mxu0 %v85_v19  ;;  %927 = vmatpush3.msra.mxu1 %v180_v20  ;;  %v278_v29 = vld [vmem:[%s1514_s26 + $0x58] sm:$0xff]  ;;  %v277_v30 = vld [vmem:[%s1514_s26 + $0x50] sm:$0xff]  ;;  %v276_v31 = vld [vmem:[%s1514_s26 + $0x48] sm:$0xff] }
  0x19   :  { %916 = vmatmul.mubr.msk.f32.vlgmr.msra.gmra.mxu0 %vm98_vm1, %v74_v21  ;;  %928 = vmatprep.subr.mxu1 %v1049_v1  ;;  %v275_v32 = vld [vmem:[%s1514_s26 + $0x40] sm:$0xff]  ;;  %v274_v33 = vld [vmem:[%s1514_s26 + $0x38] sm:$0xff]  ;;  %v273_v34 = vld [vmem:[%s1514_s26 + $0x30] sm:$0xff]  ;;  %v462_v15 = vmul.f32 -0.5, %v461_v9 }
  0x1a   :  { %929 = vmatpush3.msra.mxu1 %v179_v22  ;;  %945 = vmatprep.subr.mxu0 %v1049_v1  ;;  %v272_v35 = vld [vmem:[%s1514_s26 + $0x28] sm:$0xff]  ;;  %v271_v36 = vld [vmem:[%s1514_s26 + $0x20] sm:$0xff]  ;;  %v270_v37 = vld [vmem:[%s1514_s26 + $0x18] sm:$0xff] }
  0x1b   :  { %930 = vmatprep.subr.mxu1 %v1049_v1  ;;  %969 = vmatprep.mubr.msk.f32.mxu0 %vm1050_vm0, %v1049_v1  ;;  %v820_v38 = vld [vmem:[%s1515_s23] ss:$0 sm:$0xff]  ;;  %v269_v52 = vld [vmem:[%s1514_s26 + $0x10] sm:$0xff]  ;;  %v268_v54 = vld [vmem:[%s1514_s26 + $0x8] sm:$0xff] }
  0x1c   :  { %931 = vmatpush3.msra.mxu1 %v178_v23  ;;  %946 = vmatpush3.msra.mxu0 %v278_v29  ;;  %v267_v56 = vld [vmem:[%s1514_s26] sm:$0xff]  ;;  %v551_v23 = vld [vmem:[%s1491_s12 + $0x28] sm:$0xff] }
  0x1d   :  { %932 = vmatprep.subr.mxu1 %v1049_v1  ;;  %947 = vmatprep.subr.mxu0 %v1049_v1 }
  0x1e   :  { %933 = vmatpush3.msra.mxu1 %v177_v24  ;;  %948 = vmatpush3.msra.mxu0 %v277_v30  ;;  %v78_v24 = vrot.slane %v1180_v6, %v77_v17  ;;  %v547_v30 = vld [vmem:[%s1491_s12 + $0x8] sm:$0xff] }
  0x1f   :  { %934 = vmatprep.subr.mxu1 %v1049_v1  ;;  %949 = vmatprep.subr.mxu0 %v1049_v1 }
  0x20   :  { %935 = vmatpush3.msra.mxu1 %v176_v25  ;;  %950 = vmatpush3.msra.mxu0 %v276_v31  ;;  %v550_v25 = vld [vmem:[%s1491_s12 + $0x20] sm:$0xff] }
  0x21   :  { %936 = vmatprep.subr.mxu1 %v1049_v1  ;;  %951 = vmatprep.subr.mxu0 %v1049_v1 }
  0x22   :  { %937 = vmatpush3.msra.mxu1 %v175_v26  ;;  %952 = vmatpush3.msra.mxu0 %v275_v32  ;;  %v82_v26 = vsub.s32 3, %v1170_v4  ;;  %v548_v4 = vld [vmem:[%s1491_s12 + $0x10] sm:$0xff] }
  0x23   :  { %938 = vmatprep.subr.mxu1 %v1049_v1  ;;  %953 = vmatprep.subr.mxu0 %v1049_v1 }
  0x24   :  { %939 = vmatpush3.msra.mxu1 %v174_v27  ;;  %954 = vmatpush3.msra.mxu0 %v274_v33  ;;  %v549_v27 = vld [vmem:[%s1491_s12 + $0x18] sm:$0xff]  ;;  %v83_v29 = vrot.slane %v1180_v6, %v82_v26 }
  0x25   :  { %940 = vmatprep.subr.mxu1 %v1049_v1  ;;  %955 = vmatprep.subr.mxu0 %v1049_v1 }
  0x26   :  { %941 = vmatpush3.msra.mxu1 %v173_v28  ;;  %956 = vmatpush3.msra.mxu0 %v273_v34  ;;  %v79_v28 = vmul.f32 %v78_v24, %v1199_v12  ;;  %v546_v12 = vld [vmem:[%s1491_s12] sm:$0xff] }
  0x27   :  { %972 = vmatprep.subr.mxu1 %v1049_v1  ;;  %957 = vmatprep.subr.mxu0 %v1049_v1 }
  0x28   :  { %958 = vmatpush3.msra.mxu0 %v272_v35  ;;  %v84_v31 = vadd.f32 %v83_v29, %v79_v28  ;;  %v636_v35 = vld [vmem:[%s1494_s14 + $0x18] sm:$0xff] }
  0x29   :  { %959 = vmatprep.subr.mxu0 %v1049_v1 }
  0x2a   :  { %960 = vmatpush3.msra.mxu0 %v271_v36  ;;  %v635_v36 = vld [vmem:[%s1494_s14 + $0x10] sm:$0xff] }
  0x2b   :  { %961 = vmatprep.subr.mxu0 %v1049_v1 }
  0x2c   :  { %962 = vmatpush3.msra.mxu0 %v270_v37  ;;  %v634_v37 = vld [vmem:[%s1494_s14 + $0x8] sm:$0xff] }
  0x2d   :  { %963 = vmatprep.subr.mxu0 %v1049_v1 }
  0x2e   :  { %964 = vmatpush3.msra.mxu0 %v269_v52 }
  0x2f   :  { %965 = vmatprep.subr.mxu0 %v1049_v1 }
  0x30   :  { %966 = vmatpush3.msra.mxu0 %v268_v54 }
  0x31   :  { %967 = vmatprep.subr.mxu0 %v1049_v1 }
  0x32   :  { %968 = vmatpush3.msra.mxu0 %v267_v56  ;;  %v835_v56 = vld [vmem:[%s1499_s17] ss:$0 sm:$0xff] }
  0x33   :  { %999 = vmatprep.subr.mxu0 %v1049_v1 }
  0xd9   :  { %v168_v39 = vpop.f32.mrf.mxu0 }
  0xda   :  { %v169_v40 = vadd.f32 %v820_v38, %v168_v39  ;;  %v633_v38 = vld [vmem:[%s1494_s14] sm:$0xff]  ;;  %v722_v39 = vld [vmem:[%s1495_s16 + $0x18] sm:$0xff] }
  0xdb   :  { %v917_v41 = vpop.f32.mrf.mxu0 }
  0xdc   :  { %v172_v42 = vmax.f32 %v169_v40, 0.0 }
  0xde   :  { %943 = vmatmul.mubr.msk.f32.vlgmr.msra.gmra.mxu1 %vm192_vm2, %v172_v42 }
  0xdf   :  { %973 = vmatpush3.msra.mxu1 %v371_v43  ;;  %996 = vmatprep.mubr.msk.f32.mxu1 %vm1050_vm0, %v1049_v1  ;;  %v831_v43 = vld [vmem:[%s1497_s13] ss:$0 sm:$0xff] }
  0xe0   :  { %974 = vmatprep.subr.mxu1 %v1049_v1 }
  0xe1   :  { %975 = vmatpush3.msra.mxu1 %v370_v44 }
  0xe2   :  { %976 = vmatprep.subr.mxu1 %v1049_v1 }
  0xe3   :  { %977 = vmatpush3.msra.mxu1 %v369_v45 }
  0xe4   :  { %978 = vmatprep.subr.mxu1 %v1049_v1 }
  0xe5   :  { %979 = vmatpush3.msra.mxu1 %v368_v46 }
  0xe6   :  { %980 = vmatprep.subr.mxu1 %v1049_v1 }
  0xe7   :  { %981 = vmatpush3.msra.mxu1 %v367_v47 }
  0xe8   :  { %982 = vmatprep.subr.mxu1 %v1049_v1 }
  0xe9   :  { %983 = vmatpush3.msra.mxu1 %v366_v48  ;;  %v721_v48 = vld [vmem:[%s1495_s16 + $0x10] sm:$0xff] }
  0xea   :  { %984 = vmatprep.subr.mxu1 %v1049_v1 }
  0xeb   :  { %985 = vmatpush3.msra.mxu1 %v365_v49  ;;  %v720_v49 = vld [vmem:[%s1495_s16 + $0x8] sm:$0xff] }
  0xec   :  { %986 = vmatprep.subr.mxu1 %v1049_v1 }
  0xed   :  { %987 = vmatpush3.msra.mxu1 %v364_v50  ;;  %v719_v50 = vld [vmem:[%s1495_s16] sm:$0xff] }
  0xee   :  { %988 = vmatprep.subr.mxu1 %v1049_v1 }
  0xef   :  { %989 = vmatpush3.msra.mxu1 %v363_v51  ;;  %v833_v51 = vld [vmem:[%s1498_s15] ss:$0 sm:$0xff] }
  0xf0   :  { %990 = vmatprep.subr.mxu1 %v1049_v1 }
  0xf1   :  { %991 = vmatpush3.msra.mxu1 %v362_v53 }
  0xf2   :  { %992 = vmatprep.subr.mxu1 %v1049_v1 }
  0xf3   :  { %993 = vmatpush3.msra.mxu1 %v361_v55 }
  0xf4   :  { %994 = vmatprep.subr.mxu1 %v1049_v1 }
  0xf5   :  { %995 = vmatpush3.msra.mxu1 %v360_v57 }
  0xf6   :  { %1021 = vmatprep.subr.mxu1 %v1049_v1 }
 0x19e   :  { %v262_v59 = vpop.f32.mrf.mxu1 }
 0x19f   :  { %v263_v60 = vadd.f32 %v822_v58, %v262_v59 }
 0x1a0   :  { %v944_v61 = vpop.f32.mrf.mxu1 }
 0x1a1   :  { %v266_v62 = vmax.f32 %v263_v60, 0.0 }
 0x1a3   :  { %970 = vmatmul.mubr.msk.f32.vlgmr.msra.gmra.mxu0 %vm192_vm2, %v266_v62  ;;  %997 = vmatmul.mubr.msk.f32.vlgmr.msra.gmra.mxu1 %vm192_vm2, %v266_v62 }
 0x1a4   :  { %1003 = vmatprep.mubr.msk.f32.mxu0 %vm1050_vm0, %v1049_v1  ;;  %1029 = vmatprep.mubr.msk.f32.mxu1 %vm1050_vm0, %v1049_v1 }
 0x1a5   :  { %1000 = vmatpush3.msk.msra.mxu0 %vm469_vm3, %v465_v63  ;;  %1022 = vmatpush3.msra.mxu1 %v636_v35 }
 0x1a6   :  { %1001 = vmatprep.subr.mxu0 %v1049_v1  ;;  %1023 = vmatprep.subr.mxu1 %v1049_v1 }
 0x1a7   :  { %1002 = vmatpush3.msra.mxu0 %v464_v0  ;;  %1024 = vmatpush3.msra.mxu1 %v635_v36 }
 0x1a8   :  { %1006 = vmatprep.subr.mxu0 %v1049_v1  ;;  %1025 = vmatprep.subr.mxu1 %v1049_v1 }
 0x1a9   :  { %1026 = vmatpush3.msra.mxu1 %v634_v37 }
 0x1aa   :  { %1027 = vmatprep.subr.mxu1 %v1049_v1 }
 0x1ab   :  { %1028 = vmatpush3.msra.mxu1 %v633_v38 }
 0x263   :  { %v355_v5 = vpop.f32.mrf.mxu0  ;;  %v445_v7 = vpop.f32.mrf.mxu1 }
 0x264   :  { %v446_v8 = vadd.f32 %v826_v2, %v445_v7  ;;  %v356_v19 = vadd.f32 %v824_v16, %v355_v5 }
 0x265   :  { %v971_v10 = vpop.f32.mrf.mxu0  ;;  %v998_v11 = vpop.f32.mrf.mxu1 }
 0x266   :  { %v449_v13 = vmax.f32 %v446_v8, 0.0 }
 0x268   :  { %v450_v14 = vsub.f32 0.0, %v449_v13 }
 0x26a   :  { %v451_v18 = vmul.f32 0.5, %v450_v14 }
 0x26c   :  { %v452_v20 = vmul.f32 1.442695, %v451_v18  ;;  %v459_v21 = vadd.f32 1.4189385, %v451_v18  ;;  %v463_v22 = vsub.f32 %v462_v15, %v451_v18 }
 0x26e   :  { %1045 = vpow2.f32 %v452_v20  ;;  %460 = vst.msk [vmem:[%s1492_s19] sm:$0xff] %vm457_vm4, %v459_v21  ;;  %1004 = vmatmul.mubr.msk.f32.vlgmr.msra.gmra.mxu0 %vm457_vm4, %v463_v22 }
 0x26f   :  { %1007 = vmatpush3.msra.mxu0 %v551_v23  ;;  %1018 = vmatprep.mubr.msk.f32.mxu0 %vm1050_vm0, %v1049_v1  ;;  %1047 = vtanh.f32 %v356_v19 }
 0x270   :  { %1008 = vmatprep.subr.mxu0 %v1049_v1 }
 0x271   :  { %1009 = vmatpush3.msra.mxu0 %v550_v25 }
 0x272   :  { %1010 = vmatprep.subr.mxu0 %v1049_v1 }
 0x273   :  { %1011 = vmatpush3.msra.mxu0 %v549_v27 }
 0x274   :  { %1012 = vmatprep.subr.mxu0 %v1049_v1 }
 0x275   :  { %1013 = vmatpush3.msra.mxu0 %v548_v4 }
 0x276   :  { %1014 = vmatprep.subr.mxu0 %v1049_v1 }
 0x277   :  { %1015 = vmatpush3.msra.mxu0 %v547_v30 }
 0x278   :  { %1016 = vmatprep.subr.mxu0 %v1049_v1 }
 0x279   :  { %1017 = vmatpush3.msra.mxu0 %v546_v12 }
 0x27a   :  { %1019 = vmatmul.mubr.msk.f32.vlgmr.msra.gmra.mxu0 %vm98_vm1, %v84_v31  ;;  %1032 = vmatprep.subr.mxu0 %v1049_v1 }
 0x27b   :  { %v1046_v6 = vpop.eup %1045  ;;  %1040 = vmatprep.mubr.msk.f32.mxu0 %vm1050_vm0, %v1049_v1  ;;  %1033 = vmatpush3.msra.mxu0 %v722_v39 }
 0x27c   :  { %v455_v32 = vmul.f32 %v1046_v6, %v454_v3  ;;  %v1048_v33 = vpop.eup %1047  ;;  %1034 = vmatprep.subr.mxu0 %v1049_v1 }
 0x27d   :  { %1035 = vmatpush3.msra.mxu0 %v721_v48 }
 0x27e   :  { %v456_v34 = vadd.f32 %v1048_v33, %v455_v32  ;;  %1036 = vmatprep.subr.mxu0 %v1049_v1 }
 0x27f   :  { %1037 = vmatpush3.msra.mxu0 %v720_v49 }
 0x280   :  { %458 = vst.msk [vmem:[%s1493_s18] sm:$0xff] %vm457_vm4, %v456_v34  ;;  %1038 = vmatprep.subr.mxu0 %v1049_v1 }
 0x281   :  { %1039 = vmatpush3.msra.mxu0 %v719_v50 }
 0x32e   :  { %v539_v40 = vpop.f32.mrf.mxu0 }
 0x32f   :  { %v830_v41 = vadd.f32 -3.675754, %v539_v40 }
 0x330   :  { %v1005_v42 = vpop.f32.mrf.mxu0 }
 0x331   :  { %545 = vst.msk [vmem:[%s1496_s20] sm:$0xff] %vm544_vm5, %v830_v41 }
 0x33a   :  { %v628_v44 = vpop.f32.mrf.mxu0 }
 0x33b   :  { %v629_v45 = vadd.f32 %v831_v43, %v628_v44 }
 0x33c   :  { %v1020_v46 = vpop.f32.mrf.mxu0 }
 0x33d   :  { %v632_v47 = vmax.f32 %v629_v45, 0.0 }
 0x33f   :  { %1030 = vmatmul.mubr.msk.f32.vlgmr.msra.gmra.mxu1 %vm644_vm6, %v632_v47 }
 0x3ff   :  { %v714_v52 = vpop.f32.mrf.mxu1 }
 0x400   :  { %v715_v53 = vadd.f32 %v833_v51, %v714_v52 }
 0x401   :  { %v1031_v54 = vpop.f32.mrf.mxu1 }
 0x402   :  { %v718_v55 = vmax.f32 %v715_v53, 0.0 }
 0x404   :  { %1041 = vmatmul.mubr.msk.f32.vlgmr.msra.gmra.mxu0 %vm644_vm6, %v718_v55 }
 0x4c4   :  { %v799_v1 = vpop.f32.mrf.mxu0 }
 0x4c5   :  { %v800_v57 = vadd.f32 %v835_v56, %v799_v1 }
 0x4c6   :  { %v1042_v58 = vpop.f32.mrf.mxu0 }
 0x4c7   :  { %803 = vst.msk [vmem:[%s1500_s21] sm:$0xff] %vm544_vm5, %v800_v57 }

</bundles_post_ra>
